<compile_context>
chip_gen: v6e
topology: v6e:2x2x1
jax: 0.10.0
libtpu: 0.0.40
codegen_flags: <defaults>
</compile_context>

<pallas_src>
import functools

import jax
import jax.numpy as jnp
from jax.experimental import pallas as pl
from jax.experimental.pallas import tpu as pltpu

_LANE = 128
_SUBLANE = 8


def _round_up(x: int, m: int) -> int:
    return (x + m - 1) // m * m


def _actor_kernel(x_ref, w1_ref, b1_ref, w2_ref, b2_ref, w3_ref, b3_ref,
                  amax_ref, o_ref):
    # x arrives f32 straight from HBM; cast to bf16 in-kernel (free VPU op).
    x = x_ref[...].astype(jnp.bfloat16)
    # layer 1: Linear(state_dim, 256) + ReLU (f32 accumulate, bf16 operands)
    h1 = jnp.dot(x, w1_ref[...], preferred_element_type=jnp.float32) + b1_ref[...]
    h1 = jnp.maximum(h1, 0.0).astype(jnp.bfloat16)
    # layer 2: Linear(256, 256) + ReLU
    h2 = jnp.dot(h1, w2_ref[...], preferred_element_type=jnp.float32) + b2_ref[...]
    h2 = jnp.maximum(h2, 0.0).astype(jnp.bfloat16)
    # layer 3: Linear(256, action_dim_padded), tanh, scale by max_action
    a = jnp.dot(h2, w3_ref[...], preferred_element_type=jnp.float32) + b3_ref[...]
    # Epilogue in f32; cast once on the final store (bf16 output halves HBM
    # writeback, the dominant stream at training-scale batches).
    o_ref[...] = (amax_ref[...] * jnp.tanh(a)).astype(o_ref.dtype)


def prepare_actor_params(params, max_action):
    """One-time prep: transpose weights to [in,out], cast MXU operands to bf16,
    keep biases/max_action f32 [1,N], lane-pad the output layer to 128.
    Call once per parameter update, NOT per forward call."""
    w1, b1 = params["l1"]
    w2, b2 = params["l2"]
    w3, b3 = params["l3"]
    hidden = w1.shape[0]
    action_dim = w3.shape[0]
    out_pad = _round_up(action_dim, _LANE)

    w1_t = jnp.asarray(w1, jnp.float32).T.astype(jnp.bfloat16)          # [S, 256]
    w2_t = jnp.asarray(w2, jnp.float32).T.astype(jnp.bfloat16)          # [256, 256]
    w3_t = jnp.asarray(w3, jnp.float32).T.astype(jnp.bfloat16)          # [256, A]
    w3_p = jnp.pad(w3_t, ((0, 0), (0, out_pad - action_dim)))           # [256, 128]

    b1_r = jnp.asarray(b1, jnp.float32).reshape(1, hidden)
    b2_r = jnp.asarray(b2, jnp.float32).reshape(1, hidden)
    b3_r = jnp.pad(jnp.asarray(b3, jnp.float32).reshape(1, action_dim),
                   ((0, 0), (0, out_pad - action_dim)))
    amax = jnp.pad(jnp.asarray(max_action, jnp.float32).reshape(1, action_dim),
                   ((0, 0), (0, out_pad - action_dim)))

    return {"w1": w1_t, "b1": b1_r, "w2": w2_t, "b2": b2_r,
            "w3": w3_p, "b3": b3_r, "amax": amax}


def _pick_batch_tiling(batch: int, block_rows: int):
    """Balanced batch tiling: <=8 rows of padding waste per block, and >=2
    blocks whenever b_pad8 >= 16 so the 'parallel' grid axis can shard across
    both TensorCores on v7x (no effect on v5e/v6e)."""
    b8 = _round_up(max(batch, 1), _SUBLANE)
    nblk = pl.cdiv(b8, block_rows)
    if b8 >= 2 * _SUBLANE and nblk < 2:
        nblk = 2
    tm = _round_up(pl.cdiv(b8, nblk), _SUBLANE)
    b_pad = tm * nblk
    return tm, nblk, b_pad


def actor_forward(state, prep, action_dim, *, block_rows=512,
                  out_dtype=jnp.bfloat16, return_padded=False):
    """state: [B, state_dim] f32.  prep: output of prepare_actor_params.
    Returns [B, action_dim] actions (or the lane/row-padded block if
    return_padded=True, which avoids the post-kernel slice copy entirely).

    block_rows: batch tile upper bound.  Sweep up to 1024-2048 for large-batch
    training on v6e/v5e; keep smaller on v7x so >=2 blocks exist for megacore."""
    B, state_dim = state.shape
    hidden = prep["w1"].shape[1]
    out_pad = prep["w3"].shape[1]
    assert prep["w1"].shape[0] == state_dim

    tm, nblk, b_pad = _pick_batch_tiling(B, block_rows)

    x = state
    if b_pad != B:
        # Only wrapper-side op, and only when the batch needs row padding.
        x = jnp.pad(x, ((0, b_pad - B), (0, 0)))

    grid = (nblk,)
    x_spec = pl.BlockSpec((tm, state_dim), lambda i: (i, 0))
    o_spec = pl.BlockSpec((tm, out_pad), lambda i: (i, 0))
    # Weights/biases: same block every grid step -> stay resident in VMEM.
    res = lambda shape: pl.BlockSpec(shape, lambda i: (0, 0))

    flops = 2 * b_pad * (state_dim * hidden + hidden * hidden + hidden * out_pad)
    bytes_accessed = (
        b_pad * state_dim * 4                                            # x (f32 in)
        + b_pad * out_pad * jnp.dtype(out_dtype).itemsize                # out
        + (state_dim * hidden + hidden * hidden + hidden * out_pad) * 2  # bf16 weights
        + (hidden + hidden + out_pad + out_pad) * 4)                     # biases, amax

    out = pl.pallas_call(
        _actor_kernel,
        out_shape=jax.ShapeDtypeStruct((b_pad, out_pad), out_dtype),
        grid=grid,
        in_specs=[
            x_spec,
            res((state_dim, hidden)), res((1, hidden)),
            res((hidden, hidden)), res((1, hidden)),
            res((hidden, out_pad)), res((1, out_pad)),
            res((1, out_pad)),
        ],
        out_specs=o_spec,
        compiler_params=pltpu.CompilerParams(
            dimension_semantics=("parallel",)),
        cost_estimate=pl.CostEstimate(
            flops=flops,
            transcendentals=b_pad * out_pad,
            bytes_accessed=bytes_accessed),
    )(x, prep["w1"], prep["b1"], prep["w2"], prep["b2"],
      prep["w3"], prep["b3"], prep["amax"])

    if return_padded:
        return out
    return out[:B, :action_dim]


def init_params(key, state_dim, action_dim, hidden=256):
    """Deterministic init mimicking PyTorch nn.Linear default
    (uniform(-1/sqrt(fan_in), 1/sqrt(fan_in))), PyTorch layout w:[out,in]."""
    def linear(k, fan_in, fan_out):
        kw, kb = jax.random.split(k)
        bound = 1.0 / jnp.sqrt(fan_in)
        w = jax.random.uniform(kw, (fan_out, fan_in), jnp.float32, -bound, bound)
        b = jax.random.uniform(kb, (fan_out,), jnp.float32, -bound, bound)
        return w, b

    k1, k2, k3 = jax.random.split(key, 3)
    return {
        "l1": linear(k1, state_dim, hidden),
        "l2": linear(k2, hidden, hidden),
        "l3": linear(k3, hidden, action_dim),
    }


def _reference(state, params, max_action):
    """Reference mirroring the kernel's bf16-operand / f32-accumulate numerics."""
    w1, b1 = params["l1"]; w2, b2 = params["l2"]; w3, b3 = params["l3"]
    bf = lambda a: jnp.asarray(a, jnp.float32).astype(jnp.bfloat16).astype(jnp.float32)
    dot = functools.partial(jnp.dot, precision="highest")
    h = jnp.maximum(dot(bf(state), bf(w1).T) + b1, 0.0)
    h = jnp.maximum(dot(bf(h), bf(w2).T) + b2, 0.0)
    a = dot(bf(h), bf(w3).T) + b3
    return jnp.asarray(max_action, jnp.float32) * jnp.tanh(a)


if __name__ == "__main__":
    key = jax.random.PRNGKey(0)
    batch, state_dim, action_dim = 8, 16, 4

    k_params, k_state = jax.random.split(key)
    params = init_params(k_params, state_dim, action_dim)
    state = jax.random.normal(k_state, (batch, state_dim), jnp.float32)
    max_action = jnp.array([1.0, 2.0, 0.5, 1.5], jnp.float32)

    # One-time param prep (transposes / casts / padding live OUTSIDE the hot path).
    prep = prepare_actor_params(params, max_action)
    apply_fn = jax.jit(lambda s, p: actor_forward(s, p, action_dim))

    out = apply_fn(state, prep)
    out = jax.block_until_ready(out)

    ref = _reference(state, params, max_action)
    assert out.shape == (batch, action_dim)
    # bf16 output store -> ~2^-9 relative rounding on values up to |max_action|.
    assert jnp.allclose(out.astype(jnp.float32), ref, atol=2e-2, rtol=2e-2), \
        "mismatch vs reference"

    # TODO(synk): Actor.act()'s min/max clamp and save/load are host-side
    # utilities outside the forward pass and are not kernelized.
    print("KERNEL_OK")
</pallas_src>

<mosaic_0001>
module attributes {stable_mosaic.version = 11 : i64} {
  func.func @_actor_kernel(%arg0: i32, %arg1: memref<8x16xf32, #tpu.memory_space<vmem>>, %arg2: memref<16x256xbf16, #tpu.memory_space<vmem>>, %arg3: memref<1x256xf32, #tpu.memory_space<vmem>>, %arg4: memref<256x256xbf16, #tpu.memory_space<vmem>>, %arg5: memref<1x256xf32, #tpu.memory_space<vmem>>, %arg6: memref<256x128xbf16, #tpu.memory_space<vmem>>, %arg7: memref<1x128xf32, #tpu.memory_space<vmem>>, %arg8: memref<1x128xf32, #tpu.memory_space<vmem>>, %arg9: memref<8x128xbf16, #tpu.memory_space<vmem>>) attributes {dimension_semantics = [#tpu.dimension_semantics<parallel>], iteration_bounds = array<i64: 1>, scalar_prefetch = 0 : i64, scratch_operands = 0 : i64, tpu.core_type = #tpu.core_type<tc>, window_params = [{transform_indices = @transform_0, window_bounds = array<i64: 8, 16>}, {pipeline_mode = #tpu.pipeline_mode<synchronous>, transform_indices = @transform_1, window_bounds = array<i64: 16, 256>}, {pipeline_mode = #tpu.pipeline_mode<synchronous>, transform_indices = @transform_2, window_bounds = array<i64: 1, 256>}, {pipeline_mode = #tpu.pipeline_mode<synchronous>, transform_indices = @transform_3, window_bounds = array<i64: 256, 256>}, {pipeline_mode = #tpu.pipeline_mode<synchronous>, transform_indices = @transform_4, window_bounds = array<i64: 1, 256>}, {pipeline_mode = #tpu.pipeline_mode<synchronous>, transform_indices = @transform_5, window_bounds = array<i64: 256, 128>}, {pipeline_mode = #tpu.pipeline_mode<synchronous>, transform_indices = @transform_6, window_bounds = array<i64: 1, 128>}, {pipeline_mode = #tpu.pipeline_mode<synchronous>, transform_indices = @transform_7, window_bounds = array<i64: 1, 128>}, {transform_indices = @transform_8, window_bounds = array<i64: 8, 128>}]} {
    %c0 = arith.constant 0 : index
    %c0_0 = arith.constant 0 : index
    %0 = vector.load %arg1[%c0, %c0_0] : memref<8x16xf32, #tpu.memory_space<vmem>>, vector<8x16xf32>
    %1 = arith.truncf %0 : vector<8x16xf32> to vector<8x16xbf16>
    %c0_1 = arith.constant 0 : index
    %c0_2 = arith.constant 0 : index
    %2 = vector.load %arg2[%c0_1, %c0_2] : memref<16x256xbf16, #tpu.memory_space<vmem>>, vector<16x256xbf16>
    %cst = arith.constant dense<0.000000e+00> : vector<8x256xf32>
    %3 = tpu.matmul %1, %2, %cst {dimension_numbers = #tpu.dot_dimension_numbers<[1], [0], [0], [1], [0, 0, 1, 1], [], []>} : vector<8x16xbf16>, vector<16x256xbf16>, vector<8x256xf32> -> vector<8x256xf32>
    %c0_3 = arith.constant 0 : index
    %c0_4 = arith.constant 0 : index
    %4 = vector.load %arg3[%c0_3, %c0_4] : memref<1x256xf32, #tpu.memory_space<vmem>>, vector<1x256xf32>
    %5 = vector.broadcast %4 : vector<1x256xf32> to vector<8x256xf32>
    %6 = arith.addf %3, %5 : vector<8x256xf32>
    %cst_5 = arith.constant 0.000000e+00 : f32
    %7 = vector.broadcast %cst_5 : f32 to vector<8x256xf32>
    %8 = arith.maximumf %6, %7 : vector<8x256xf32>
    %9 = arith.truncf %8 : vector<8x256xf32> to vector<8x256xbf16>
    %c0_6 = arith.constant 0 : index
    %c0_7 = arith.constant 0 : index
    %10 = vector.load %arg4[%c0_6, %c0_7] : memref<256x256xbf16, #tpu.memory_space<vmem>>, vector<256x256xbf16>
    %cst_8 = arith.constant dense<0.000000e+00> : vector<8x256xf32>
    %11 = tpu.matmul %9, %10, %cst_8 {dimension_numbers = #tpu.dot_dimension_numbers<[1], [0], [0], [1], [0, 0, 1, 1], [], []>} : vector<8x256xbf16>, vector<256x256xbf16>, vector<8x256xf32> -> vector<8x256xf32>
    %c0_9 = arith.constant 0 : index
    %c0_10 = arith.constant 0 : index
    %12 = vector.load %arg5[%c0_9, %c0_10] : memref<1x256xf32, #tpu.memory_space<vmem>>, vector<1x256xf32>
    %13 = vector.broadcast %12 : vector<1x256xf32> to vector<8x256xf32>
    %14 = arith.addf %11, %13 : vector<8x256xf32>
    %cst_11 = arith.constant 0.000000e+00 : f32
    %15 = vector.broadcast %cst_11 : f32 to vector<8x256xf32>
    %16 = arith.maximumf %14, %15 : vector<8x256xf32>
    %17 = arith.truncf %16 : vector<8x256xf32> to vector<8x256xbf16>
    %c0_12 = arith.constant 0 : index
    %c0_13 = arith.constant 0 : index
    %18 = vector.load %arg6[%c0_12, %c0_13] : memref<256x128xbf16, #tpu.memory_space<vmem>>, vector<256x128xbf16>
    %cst_14 = arith.constant dense<0.000000e+00> : vector<8x128xf32>
    %19 = tpu.matmul %17, %18, %cst_14 {dimension_numbers = #tpu.dot_dimension_numbers<[1], [0], [0], [1], [0, 0, 1, 1], [], []>} : vector<8x256xbf16>, vector<256x128xbf16>, vector<8x128xf32> -> vector<8x128xf32>
    %c0_15 = arith.constant 0 : index
    %c0_16 = arith.constant 0 : index
    %20 = vector.load %arg7[%c0_15, %c0_16] : memref<1x128xf32, #tpu.memory_space<vmem>>, vector<1x128xf32>
    %21 = vector.broadcast %20 : vector<1x128xf32> to vector<8x128xf32>
    %22 = arith.addf %19, %21 : vector<8x128xf32>
    %c0_17 = arith.constant 0 : index
    %c0_18 = arith.constant 0 : index
    %23 = vector.load %arg8[%c0_17, %c0_18] : memref<1x128xf32, #tpu.memory_space<vmem>>, vector<1x128xf32>
    %24 = math.tanh %22 : vector<8x128xf32>
    %25 = vector.broadcast %23 : vector<1x128xf32> to vector<8x128xf32>
    %26 = arith.mulf %25, %24 : vector<8x128xf32>
    %27 = arith.truncf %26 : vector<8x128xf32> to vector<8x128xbf16>
    %c0_19 = arith.constant 0 : index
    %c0_20 = arith.constant 0 : index
    %28 = vector.load %arg9[%c0_19, %c0_20] : memref<8x128xbf16, #tpu.memory_space<vmem>>, vector<8x128xbf16>
    tpu.vector_store %arg9[%c0_19, %c0_20], %27 {strides = array<i32>} : memref<8x128xbf16, #tpu.memory_space<vmem>>, vector<8x128xbf16>,
    return
  }
  func.func @transform_0(%arg0: i32) -> (i32, i32) {
    %c0_i32 = arith.constant 0 : i32
    %c0_i32_0 = arith.constant 0 : i32
    return %arg0, %c0_i32 : i32, i32
  }
  func.func @transform_1(%arg0: i32) -> (i32, i32) {
    %c0_i32 = arith.constant 0 : i32
    %c0_i32_0 = arith.constant 0 : i32
    %c0_i32_1 = arith.constant 0 : i32
    return %c0_i32, %c0_i32_0 : i32, i32
  }
  func.func @transform_2(%arg0: i32) -> (i32, i32) {
    %c0_i32 = arith.constant 0 : i32
    %c0_i32_0 = arith.constant 0 : i32
    %c0_i32_1 = arith.constant 0 : i32
    return %c0_i32, %c0_i32_0 : i32, i32
  }
  func.func @transform_3(%arg0: i32) -> (i32, i32) {
    %c0_i32 = arith.constant 0 : i32
    %c0_i32_0 = arith.constant 0 : i32
    %c0_i32_1 = arith.constant 0 : i32
    return %c0_i32, %c0_i32_0 : i32, i32
  }
  func.func @transform_4(%arg0: i32) -> (i32, i32) {
    %c0_i32 = arith.constant 0 : i32
    %c0_i32_0 = arith.constant 0 : i32
    %c0_i32_1 = arith.constant 0 : i32
    return %c0_i32, %c0_i32_0 : i32, i32
  }
  func.func @transform_5(%arg0: i32) -> (i32, i32) {
    %c0_i32 = arith.constant 0 : i32
    %c0_i32_0 = arith.constant 0 : i32
    %c0_i32_1 = arith.constant 0 : i32
    return %c0_i32, %c0_i32_0 : i32, i32
  }
  func.func @transform_6(%arg0: i32) -> (i32, i32) {
    %c0_i32 = arith.constant 0 : i32
    %c0_i32_0 = arith.constant 0 : i32
    %c0_i32_1 = arith.constant 0 : i32
    return %c0_i32, %c0_i32_0 : i32, i32
  }
  func.func @transform_7(%arg0: i32) -> (i32, i32) {
    %c0_i32 = arith.constant 0 : i32
    %c0_i32_0 = arith.constant 0 : i32
    %c0_i32_1 = arith.constant 0 : i32
    return %c0_i32, %c0_i32_0 : i32, i32
  }
  func.func @transform_8(%arg0: i32) -> (i32, i32) {
    %c0_i32 = arith.constant 0 : i32
    %c0_i32_0 = arith.constant 0 : i32
    return %arg0, %c0_i32 : i32, i32
  }
}

</mosaic_0001>

<bundles_post_ra>
// kernel: _lambda_.1
= control target key start
LH: loop header
LB: loop body
LE: loop exit
PB: predicated region body
PF: predicated region fallthrough
CT: control target
= control target key end

     0   :  { %13 = vsyncpa [#allocation3], 0  ;;  %s959_s0 = inlined_call_operand.hbm [shape: f32[8,16], index: 0, kind: input, shape index: {}]   ;;  %s960_s1 = inlined_call_operand.hbm [shape: bf16[16,256], index: 1, kind: input, shape index: {}]   ;;  %s961_s2 = inlined_call_operand.vmem [shape: f32[1,256], index: 2, kind: input, shape index: {}]   ;;  %s962_s3 = inlined_call_operand.hbm [shape: bf16[256,256], index: 3, kind: input, shape index: {}]   ;;  %s963_s4 = inlined_call_operand.vmem [shape: f32[1,256], index: 4, kind: input, shape index: {}]   ;;  %s964_s5 = inlined_call_operand.hbm [shape: bf16[256,128], index: 5, kind: input, shape index: {}]   ;;  %s965_s6 = inlined_call_operand.vmem [shape: f32[1,128], index: 6, kind: input, shape index: {}]   ;;  %s966_s7 = inlined_call_operand.hbm [shape: f32[1,128], index: 7, kind: input, shape index: {}]   ;;  %s967_s8 = inlined_call_operand.vmem [shape: bf16[8,128], index: 8, kind: output, shape index: {}]  }
   0x1   :  { %14 = vsyncpa [#allocation5], 0 }
   0x2   :  { %15 = vsyncpa [#allocation8], 0  ;;  %s871_s27 = smov [#allocation4]  }
   0x3   :  { %s31_s28 = sshll.u32 %s871_s27, 4  ;;  %s32_s28 = int_to_ptr.vmem [resolvable:$true] %s31_s28 }
   0x4   :  { %s773_s29 = scalar_lea.vmem %s32_s28, 256  ;;  %p778_p1 = scmp.lt.s32.totalorder %s32_s28, %s32_s28 }
   0x5   :  { %p774_p0 = scmp.ne.s32.totalorder %s32_s28, %s773_s29  ;;  %p779_p2 = scmp.lt.s32.totalorder %s773_s29, %s773_s29 }
   0x7   :  { %p780_p3 = por %p779_p2, %p778_p1 }
   0x9   :  { %p781_p4 = pnand %p780_p3, %p774_p0 }
   0xb   :  { %784 = shalt.err (!%p781_p4)
}
   0xc   :  { %s872_s30 = smov 128   ;;  %s873_s9 = smov 8  }
   0xd   :  { %37 = dma.hbm_to_vmem [thread:$0]  %s960_s1, 256, %s32_s28, [#allocation5], %s872_s30, %s872_s30, %s873_s9  }
   0xe   :  { %s874_s12 = smov [#allocation7]  }
   0xf   :  { %s59_s13 = sshll.u32 %s874_s12, 4  ;;  %s60_s13 = int_to_ptr.vmem [resolvable:$true] %s59_s13 }
  0x10   :  { %s793_s14 = scalar_lea.vmem %s60_s13, 2048  ;;  %p798_p6 = scmp.lt.s32.totalorder %s60_s13, %s60_s13 }
  0x11   :  { %p794_p5 = scmp.ne.s32.totalorder %s60_s13, %s793_s14  ;;  %p799_p7 = scmp.lt.s32.totalorder %s793_s14, %s793_s14 }
  0x13   :  { %p800_p8 = por %p799_p7, %p798_p6 }
  0x15   :  { %p801_p9 = pnand %p800_p8, %p794_p5 }
  0x17   :  { %804 = shalt.err (!%p801_p9)
}
  0x18   :  { %s875_s15 = smov 64   ;;  %s876_s16 = smov 4  }
  0x19   :  { %65 = dma.hbm_to_vmem [thread:$0]  %s964_s5, 2048, %s60_s13, [#allocation8], %s875_s15, %s875_s15, %s876_s16  }
  0x1a   :  { %s877_s19 = smov [#allocation2]   ;;  %s878_s21 = smov [#allocation6]  }
  0x1b   :  { %s22_s20 = sshll.u32 %s877_s19, 4  ;;  %s45_s1 = sshll.u32 %s878_s21, 4  ;;  %s23_s20 = int_to_ptr.vmem [resolvable:$true] %s22_s20  ;;  %s46_s1 = int_to_ptr.vmem [resolvable:$true] %s45_s1 }
  0x1c   :  { %s813_s22 = scalar_lea.vmem %s23_s20, 128  ;;  %p818_p11 = scmp.lt.s32.totalorder %s23_s20, %s23_s20 }
  0x1d   :  { %p814_p10 = scmp.ne.s32.totalorder %s23_s20, %s813_s22  ;;  %p819_p12 = scmp.lt.s32.totalorder %s813_s22, %s813_s22 }
  0x1f   :  { %p820_p13 = por %p819_p12, %p818_p11 }
  0x21   :  { %p821_p0 = pnand %p820_p13, %p814_p10 }
  0x23   :  { %824 = shalt.err (!%p821_p0)
}
  0x24   :  { %25 = dma.hbm_to_vmem [thread:$0]  %s959_s0, 128, %s23_s20, [#allocation3]  }
  0x25   :  { %s833_s25 = scalar_lea.vmem %s46_s1, 4096  ;;  %p838_p2 = scmp.lt.s32.totalorder %s46_s1, %s46_s1 }
  0x26   :  { %p834_p1 = scmp.ne.s32.totalorder %s46_s1, %s833_s25  ;;  %p839_p3 = scmp.lt.s32.totalorder %s833_s25, %s833_s25 }
  0x28   :  { %p840_p4 = por %p839_p3, %p838_p2 }
  0x2a   :  { %p841_p5 = pnand %p840_p4, %p834_p1 }
  0x2c   :  { %844 = shalt.err (!%p841_p5)
}
  0x2d   :  { %51 = dma.hbm_to_vmem [thread:$0]  %s962_s3, 4096, %s46_s1, [#allocation5], %s872_s30, %s872_s30, %s873_s9  }
  0x2e   :  { %s879_s27 = smov [#allocation9]  }
  0x2f   :  { %s74_s28 = sshll.u32 %s879_s27, 4  ;;  %s75_s28 = int_to_ptr.vmem [resolvable:$true] %s74_s28 }
  0x30   :  { %s853_s29 = scalar_lea.vmem %s75_s28, 16  ;;  %s857_s0 = scalar_lea.vmem %s75_s28, 32 }
  0x31   :  { %p854_p6 = scmp.ne.s32.totalorder %s75_s28, %s853_s29  ;;  %p858_p7 = scmp.lt.s32.totalorder %s75_s28, %s75_s28 }
  0x32   :  { %p859_p8 = scmp.lt.s32.totalorder %s857_s0, %s853_s29 }
  0x34   :  { %p860_p9 = por %p859_p8, %p858_p7 }
  0x36   :  { %p861_p10 = pnand %p860_p9, %p854_p6 }
  0x38   :  { %864 = shalt.err (!%p861_p10)
}
  0x39   :  { %77 = dma.hbm_to_vmem [thread:$0]  %s966_s7, 16, %s75_s28, [#allocation8]  }
  0x3a   :  { %865 = dma.done.wait [#allocation3], 128  }
  0x3b   :  { %866 = vsyncadd [#allocation3], 4294967168 }
  0x3c   :  { %867 = dma.done.wait [#allocation5], 4352  }
  0x3d   :  { %868 = vsyncadd [#allocation5], 4294962944 }
  0x3e   :  { %869 = dma.done.wait [#allocation8], 2064  }
  0x3f   :  { %870 = vsyncadd [#allocation8], 4294965232  ;;  %v880_v0 = vmov 0   ;;  %v696_v1 = vld [vmem:[#allocation4 + $0x4] ss:$8 sps:$4 sm:$0xff]   ;;  %v94_v3 = vld [vmem:[#allocation2] sm:$0xff]  ;;  %v100_v49 = vlaneseq }
  0x40   :  { %156 = vmatprep.mubr.bf16.mxu0 %v880_v0  ;;  %v698_v2 = vld [vmem:[#allocation4] ss:$8 sps:$4 sm:$0xff]   ;;  %138 = vmatprep.subr.bf16.mxu0 %v696_v1  ;;  %v95_v4 = vpack.c.bf16 %v94_v3, %v94_v3  ;;  %v699_v5 = vld [vmem:[#allocation6 + $0x74] ss:$8 sps:$4 sm:$0xff]   ;;  %vm120_vm0 = vcmask 130048   ;;  %v751_v41 = vld [vmem:[#allocation7 + $0x68] sm:$0xff]  }
  0x41   :  { %v701_v6 = vld [vmem:[#allocation6 + $0x70] ss:$8 sps:$4 sm:$0xff]   ;;  %139 = vmatpush1.bf16.msra.mxu0 %v698_v2  ;;  %v702_v7 = vld [vmem:[#allocation6 + $0x64] ss:$8 sps:$4 sm:$0xff]   ;;  %373 = vmatprep.subr.bf16.mxu1 %v699_v5  ;;  %v704_v8 = vld [vmem:[#allocation6 + $0x60] ss:$8 sps:$4 sm:$0xff]  }
  0x42   :  { %374 = vmatpush1.bf16.msra.mxu1 %v701_v6  ;;  %v705_v9 = vld [vmem:[#allocation6 + $0x54] ss:$8 sps:$4 sm:$0xff]   ;;  %v707_v10 = vld [vmem:[#allocation6 + $0x50] ss:$8 sps:$4 sm:$0xff]   ;;  %v708_v11 = vld [vmem:[#allocation6 + $0x44] ss:$8 sps:$4 sm:$0xff]  }
  0x43   :  { %375 = vmatprep.subr.bf16.mxu1 %v702_v7  ;;  %v710_v12 = vld [vmem:[#allocation6 + $0x40] ss:$8 sps:$4 sm:$0xff]   ;;  %v711_v13 = vld [vmem:[#allocation6 + $0x34] ss:$8 sps:$4 sm:$0xff]   ;;  %v713_v14 = vld [vmem:[#allocation6 + $0x30] ss:$8 sps:$4 sm:$0xff]  }
  0x44   :  { %613 = vmatmul.mubr.msk.bf16.vlgmr.msra.gmra.mxu0 %vm120_vm0, %v95_v4  ;;  %v714_v15 = vld [vmem:[#allocation6 + $0x24] ss:$8 sps:$4 sm:$0xff]   ;;  %v716_v16 = vld [vmem:[#allocation6 + $0x20] ss:$8 sps:$4 sm:$0xff]   ;;  %v717_v17 = vld [vmem:[#allocation6 + $0x14] ss:$8 sps:$4 sm:$0xff]  }
  0x45   :  { %v719_v18 = vld [vmem:[#allocation6 + $0x10] ss:$8 sps:$4 sm:$0xff]   ;;  %v720_v19 = vld [vmem:[#allocation6 + $0x4] ss:$8 sps:$4 sm:$0xff]   ;;  %v722_v20 = vld [vmem:[#allocation6] ss:$8 sps:$4 sm:$0xff]  }
  0x46   :  { %376 = vmatpush1.bf16.msra.mxu1 %v704_v8  ;;  %v723_v21 = vld [vmem:[#allocation6 + $0xf4] ss:$8 sps:$4 sm:$0xff]   ;;  %v725_v22 = vld [vmem:[#allocation6 + $0xf0] ss:$8 sps:$4 sm:$0xff]   ;;  %v726_v23 = vld [vmem:[#allocation6 + $0xe4] ss:$8 sps:$4 sm:$0xff]  }
  0x47   :  { %377 = vmatprep.subr.bf16.mxu1 %v705_v9  ;;  %v728_v24 = vld [vmem:[#allocation6 + $0xe0] ss:$8 sps:$4 sm:$0xff]   ;;  %v729_v25 = vld [vmem:[#allocation6 + $0xd4] ss:$8 sps:$4 sm:$0xff]   ;;  %v731_v26 = vld [vmem:[#allocation6 + $0xd0] ss:$8 sps:$4 sm:$0xff]  }
  0x48   :  { %v732_v27 = vld [vmem:[#allocation6 + $0xc4] ss:$8 sps:$4 sm:$0xff]   ;;  %v734_v28 = vld [vmem:[#allocation6 + $0xc0] ss:$8 sps:$4 sm:$0xff]   ;;  %v735_v29 = vld [vmem:[#allocation6 + $0xb4] ss:$8 sps:$4 sm:$0xff]  }
  0x49   :  { %v737_v30 = vld [vmem:[#allocation6 + $0xb0] ss:$8 sps:$4 sm:$0xff]   ;;  %v738_v31 = vld [vmem:[#allocation6 + $0xa4] ss:$8 sps:$4 sm:$0xff]   ;;  %v740_v32 = vld [vmem:[#allocation6 + $0xa0] ss:$8 sps:$4 sm:$0xff]  }
  0x4a   :  { %378 = vmatpush1.bf16.msra.mxu1 %v707_v10  ;;  %v741_v33 = vld [vmem:[#allocation6 + $0x94] ss:$8 sps:$4 sm:$0xff]   ;;  %v743_v34 = vld [vmem:[#allocation6 + $0x90] ss:$8 sps:$4 sm:$0xff]   ;;  %v744_v35 = vld [vmem:[#allocation6 + $0x84] ss:$8 sps:$4 sm:$0xff]  }
  0x4b   :  { %379 = vmatprep.subr.bf16.mxu1 %v708_v11  ;;  %v746_v36 = vld [vmem:[#allocation6 + $0x80] ss:$8 sps:$4 sm:$0xff]   ;;  %v747_v37 = vld [vmem:[#allocation7 + $0x78] sm:$0xff]   ;;  %v749_v39 = vld [vmem:[#allocation7 + $0x70] sm:$0xff]   ;;  %v101_v50 = vshrl.u32 %v100_v49, 7 }
  0x4c   :  { %v748_v38 = vld [vmem:[#allocation7 + $0x38] sm:$0xff]   ;;  %664 = vmatprep.subr.bf16.mxu0 %v747_v37  ;;  %v750_v40 = vld [vmem:[#allocation7 + $0x30] sm:$0xff]   ;;  %v752_v42 = vld [vmem:[#allocation7 + $0x28] sm:$0xff]  }
  0x4d   :  { %665 = vmatpush3.bf16.msra.mxu0 %v748_v38  ;;  %v753_v43 = vld [vmem:[#allocation7 + $0x60] sm:$0xff]   ;;  %v755_v45 = vld [vmem:[#allocation7 + $0x58] sm:$0xff]   ;;  %v757_v47 = vld [vmem:[#allocation7 + $0x50] sm:$0xff]   ;;  %v102_v51 = vsub.s32 0, %v101_v50  ;;  %v106_v53 = vsub.s32 1, %v101_v50 }
  0x4e   :  { %380 = vmatpush1.bf16.msra.mxu1 %v710_v12  ;;  %666 = vmatprep.subr.bf16.mxu0 %v749_v39  ;;  %v754_v44 = vld [vmem:[#allocation7 + $0x20] sm:$0xff]   ;;  %v756_v46 = vld [vmem:[#allocation7 + $0x18] sm:$0xff]   ;;  %v758_v48 = vld [vmem:[#allocation7 + $0x10] sm:$0xff]  }
  0x4f   :  { %381 = vmatprep.subr.bf16.mxu1 %v711_v13  ;;  %v98_v52 = vld [vmem:[%s961_s2] sm:$0x3]  ;;  %v761_v4 = vld [vmem:[#allocation7 + $0x40] sm:$0xff]  }
  0x50   :  { %v103_v54 = vrot.slane %v98_v52, %v102_v51  ;;  %v107_v55 = vrot.slane %v98_v52, %v106_v53  ;;  %v759_v2 = vld [vmem:[#allocation7 + $0x48] sm:$0xff]   ;;  %v762_v5 = vld [vmem:[#allocation7] sm:$0xff]  }
  0x51   :  { %667 = vmatpush3.bf16.msra.mxu0 %v750_v40  ;;  %v760_v3 = vld [vmem:[#allocation7 + $0x8] sm:$0xff]  }
  0x52   :  { %382 = vmatpush1.bf16.msra.mxu1 %v713_v14  ;;  %668 = vmatprep.subr.bf16.mxu0 %v751_v41  ;;  %v201_v6 = vld [vmem:[%s963_s4] sm:$0x3] }
  0x53   :  { %383 = vmatprep.subr.bf16.mxu1 %v714_v15  ;;  %v206_v7 = vrot.slane %v201_v6, %v102_v51  ;;  %v210_v8 = vrot.slane %v201_v6, %v106_v53 }
  0x55   :  { %669 = vmatpush3.bf16.msra.mxu0 %v752_v42 }
  0x56   :  { %384 = vmatpush1.bf16.msra.mxu1 %v716_v16  ;;  %670 = vmatprep.subr.bf16.mxu0 %v753_v43 }
  0x57   :  { %385 = vmatprep.subr.bf16.mxu1 %v717_v17 }
  0x59   :  { %671 = vmatpush3.bf16.msra.mxu0 %v754_v44 }
  0x5a   :  { %386 = vmatpush1.bf16.msra.mxu1 %v719_v18  ;;  %672 = vmatprep.subr.bf16.mxu0 %v755_v45 }
  0x5b   :  { %387 = vmatprep.subr.bf16.mxu1 %v720_v19 }
  0x5d   :  { %673 = vmatpush3.bf16.msra.mxu0 %v756_v46 }
  0x5e   :  { %388 = vmatpush1.bf16.msra.mxu1 %v722_v20  ;;  %674 = vmatprep.subr.bf16.mxu0 %v757_v47  ;;  %v646_v20 = vld [vmem:[%s965_s6] ss:$0 sm:$0xff] }
  0x5f   :  { %389 = vmatprep.subr.bf16.mxu1 %v723_v21 }
  0x61   :  { %675 = vmatpush3.bf16.msra.mxu0 %v758_v48 }
  0x62   :  { %390 = vmatpush2.bf16.msra.mxu1 %v725_v22  ;;  %676 = vmatprep.subr.bf16.mxu0 %v759_v2 }
  0x63   :  { %391 = vmatprep.subr.bf16.mxu1 %v726_v23 }
  0x65   :  { %677 = vmatpush3.bf16.msra.mxu0 %v760_v3 }
  0x66   :  { %392 = vmatpush2.bf16.msra.mxu1 %v728_v24  ;;  %678 = vmatprep.subr.bf16.mxu0 %v761_v4 }
  0x67   :  { %393 = vmatprep.subr.bf16.mxu1 %v729_v25 }
  0x69   :  { %679 = vmatpush3.bf16.msra.mxu0 %v762_v5 }
  0x6a   :  { %394 = vmatpush2.bf16.msra.mxu1 %v731_v26  ;;  %v663_v26 = vld [vmem:[#allocation9] ss:$0 sm:$0xff] }
  0x6b   :  { %395 = vmatprep.subr.bf16.mxu1 %v732_v27 }
  0x6e   :  { %396 = vmatpush2.bf16.msra.mxu1 %v734_v28 }
  0x6f   :  { %397 = vmatprep.subr.bf16.mxu1 %v735_v29 }
  0x72   :  { %398 = vmatpush2.bf16.msra.mxu1 %v737_v30 }
  0x73   :  { %399 = vmatprep.subr.bf16.mxu1 %v738_v31 }
  0x76   :  { %400 = vmatpush2.bf16.msra.mxu1 %v740_v32 }
  0x77   :  { %401 = vmatprep.subr.bf16.mxu1 %v741_v33 }
  0x7a   :  { %402 = vmatpush2.bf16.msra.mxu1 %v743_v34 }
  0x7b   :  { %403 = vmatprep.subr.bf16.mxu1 %v744_v35 }
  0x7e   :  { %404 = vmatpush2.bf16.msra.mxu1 %v746_v36 }
 0x104   :  { %v158_v56 = vpop.f32.mrf.mxu0 }
 0x105   :  { %v159_v57 = vadd.f32 %v158_v56, %v103_v54 }
 0x106   :  { %v160_v58 = vpop.f32.mrf.mxu0 }
 0x107   :  { %v161_v59 = vadd.f32 %v160_v58, %v107_v55  ;;  %v165_v60 = vmax.f32 %v159_v57, 0.0 }
 0x108   :  { %v162_v61 = vpop.f32.mrf.mxu0 }
 0x109   :  { %v166_v62 = vmax.f32 %v161_v59, 0.0  ;;  %v167_v1 = vpack.c.bf16 %v165_v60, %v165_v60 }
 0x10a   :  { %v163_v63 = vpop.f32.mrf.mxu0 }
 0x10b   :  { %v168_v0 = vpack.c.bf16 %v166_v62, %v166_v62 }
 0x10d   :  { %405 = vmatprep.mubr.bf16.mxu1 %v168_v0 }
 0x10e   :  { %406 = vmatmul.mubr.bf16.vlgmr.msra.gmra.mxu1 %v167_v1 }
 0x1ce   :  { %v407_v9 = vpop.f32.mrf.mxu1 }
 0x1cf   :  { %v408_v10 = vadd.f32 %v407_v9, %v206_v7 }
 0x1d0   :  { %v409_v11 = vpop.f32.mrf.mxu1 }
 0x1d1   :  { %v410_v12 = vadd.f32 %v409_v11, %v210_v8  ;;  %v414_v13 = vmax.f32 %v408_v10, 0.0 }
 0x1d2   :  { %v411_v14 = vpop.f32.mrf.mxu1 }
 0x1d3   :  { %v415_v15 = vmax.f32 %v410_v12, 0.0  ;;  %v416_v18 = vpack.c.bf16 %v414_v13, %v414_v13 }
 0x1d4   :  { %v412_v16 = vpop.f32.mrf.mxu1 }
 0x1d5   :  { %v417_v17 = vpack.c.bf16 %v415_v15, %v415_v15 }
 0x1d7   :  { %585 = vmatprep.mubr.bf16.mxu0 %v417_v17 }
 0x1d8   :  { %586 = vmatmul.mubr.bf16.vlgmr.msra.gmra.mxu0 %v416_v18 }
 0x298   :  { %v680_v19 = vpop.f32.mrf.mxu0 }
 0x29a   :  { %v681_v21 = vpop.f32.mrf.mxu0 }
 0x29b   :  { %v682_v22 = vadd.f32 %v681_v21, %v680_v19 }
 0x29c   :  { %v683_v23 = vpop.f32.mrf.mxu0 }
 0x29d   :  { %v588_v24 = vadd.f32 %v682_v22, %v646_v20 }
 0x29e   :  { %v684_v25 = vpop.f32.mrf.mxu0 }
 0x29f   :  { %763 = vtanh.f32 %v588_v24 }
 0x2ac   :  { %v764_v27 = vpop.eup %763 }
 0x2ad   :  { %v601_v28 = vmul.f32 %v764_v27, %v663_v26 }
 0x2af   :  { %v602_v29 = vpack.c.bf16 %v601_v28, %v601_v28 }
 0x2b1   :  { %603 = vst [vmem:[%s967_s8] sm:$0xf] %v602_v29 }
 0x2b2   :  { %608 = vsyncpa [#allocation3], 1 }
 0x2b3   :  { %609 = vsyncpa [#allocation5], 1 }
 0x2b4   :  { %610 = vsyncpa [#allocation8], 1 }

</bundles_post_ra>
